<compile_context>
chip_gen: v7x
topology: tpu7x:2x2x1
jax: 0.10.0
libtpu: 0.0.40
codegen_flags: <defaults>
</compile_context>

<pallas_src>
import functools

import jax
import jax.numpy as jnp
from jax.experimental import pallas as pl
from jax.experimental.pallas import tpu as pltpu


# ---------------------------------------------------------------------------
# Pallas kernel: both levels' fused 1x1-conv heads, Nb images per grid step
# ---------------------------------------------------------------------------
def _make_heads_kernel(nb):
    """Block shapes seen by the kernel:
      x1_ref: (Nb, C1, HW1) f32    w1_ref: (3L, C1) bf16   b1_ref: (3L, 1) f32
      x2_ref: (Nb, C2, HW2) f32    w2_ref: (3L, C2) bf16   b2_ref: (3L, 1) f32
      y1_ref: (Nb, 3L, HW1) f32    y2_ref: (Nb, 3L, HW2) f32
    """

    def kernel(x1_ref, x2_ref, w1_ref, b1_ref, w2_ref, b2_ref, y1_ref, y2_ref):
        w1 = w1_ref[...]
        w2 = w2_ref[...]
        b1 = b1_ref[...]
        b2 = b2_ref[...]
        # Short static unroll over the per-step batch (Nb is tiny).
        for n in range(nb):
            # In-kernel bf16 cast of the activations (VPU, free under slack);
            # MXU matmul with f32 accumulation, f32 bias add, f32 store.
            x1 = x1_ref[n].astype(jnp.bfloat16)           # (C1, HW1)
            x2 = x2_ref[n].astype(jnp.bfloat16)           # (C2, HW2)
            y1_ref[n] = jnp.dot(w1, x1,
                                preferred_element_type=jnp.float32) + b1
            y2_ref[n] = jnp.dot(w2, x2,
                                preferred_element_type=jnp.float32) + b2

    return kernel


# ---------------------------------------------------------------------------
# One-time parameter fusion (hoisted OUT of the jitted forward)
# ---------------------------------------------------------------------------
def fuse_level_params(params):
    """(hm, x, y) conv1x1 params -> W_fused (3L, C) bf16, b_fused (3L, 1) f32."""
    w = jnp.concatenate([params["hm_w"], params["x_w"], params["y_w"]], axis=0)
    b = jnp.concatenate([params["hm_b"], params["x_b"], params["y_b"]], axis=0)
    return w.astype(jnp.bfloat16), b.reshape(-1, 1).astype(jnp.float32)


# ---------------------------------------------------------------------------
# Wrapper
# ---------------------------------------------------------------------------
def pipnet_heads(x1, x2, w1, b1, w2, b2, n_landmarks, grid_steps):
    N, C1, H1, W1 = x1.shape
    N2, C2, H2, W2 = x2.shape
    assert N == N2, (N, N2)
    assert N % grid_steps == 0, (N, grid_steps)
    L = n_landmarks
    K = 3 * L
    HW1, HW2 = H1 * W1, H2 * W2
    Nb = N // grid_steps
    # HW1 = 256 -> lane-dense (unmasked) 128-wide stores for level 1.
    # HW2 = 64 is a full-extent block (exempt from the 128-lane rule); its
    # masked stores are negligible at this data volume.  K = 48 keeps the
    # output rows sublane-aligned (multiple of 8).

    # NCHW -> (N, C, H*W): contiguous reshape (free); activations stay f32.
    x1f = x1.reshape(N, C1, HW1)
    x2f = x2.reshape(N, C2, HW2)

    out_shape = [
        jax.ShapeDtypeStruct((N, K, HW1), jnp.float32),   # [hm1; x_off1; y_off1]
        jax.ShapeDtypeStruct((N, K, HW2), jnp.float32),   # [hm2; x_off2; y_off2]
    ]

    spec_x1 = pl.BlockSpec((Nb, C1, HW1), lambda n: (n, 0, 0))
    spec_x2 = pl.BlockSpec((Nb, C2, HW2), lambda n: (n, 0, 0))
    spec_w1 = pl.BlockSpec((K, C1), lambda n: (0, 0))     # resident across grid
    spec_w2 = pl.BlockSpec((K, C2), lambda n: (0, 0))
    spec_b1 = pl.BlockSpec((K, 1), lambda n: (0, 0))
    spec_b2 = pl.BlockSpec((K, 1), lambda n: (0, 0))
    spec_y1 = pl.BlockSpec((Nb, K, HW1), lambda n: (n, 0, 0))
    spec_y2 = pl.BlockSpec((Nb, K, HW2), lambda n: (n, 0, 0))

    cost = pl.CostEstimate(
        flops=2 * N * K * (C1 * HW1 + C2 * HW2),
        transcendentals=0,
        bytes_accessed=(4 * (x1f.size + x2f.size)          # f32 activations
                        + 2 * (w1.size + w2.size)          # bf16 weights
                        + 4 * (b1.size + b2.size)          # f32 biases
                        + 4 * N * K * (HW1 + HW2)),        # f32 outputs
    )

    y1, y2 = pl.pallas_call(
        _make_heads_kernel(Nb),
        out_shape=out_shape,
        grid_spec=pltpu.PrefetchScalarGridSpec(
            num_scalar_prefetch=0,
            grid=(grid_steps,),
            in_specs=[spec_x1, spec_x2, spec_w1, spec_b1, spec_w2, spec_b2],
            out_specs=[spec_y1, spec_y2],
        ),
        compiler_params=pltpu.CompilerParams(
            dimension_semantics=("parallel",),
        ),
        cost_estimate=cost,
    )(x1f, x2f, w1, b1, w2, b2)

    # Free contiguous reshapes + cheap slices back to (N, L, H, W) per head.
    y1 = y1.reshape(N, 3, L, H1, W1)
    y2 = y2.reshape(N, 3, L, H2, W2)
    lvl1 = (y1[:, 0], y1[:, 1], y1[:, 2])
    lvl2 = (y2[:, 0], y2[:, 1], y2[:, 2])
    return [lvl1, lvl2]


@functools.partial(jax.jit, static_argnames=("n_landmarks", "grid_steps"))
def pipnet_forward(x1, x2, w1, b1, w2, b2, n_landmarks, grid_steps):
    """output_stride=[16, 32], mode='train' branch of PIPNet.forward."""
    return pipnet_heads(x1, x2, w1, b1, w2, b2, n_landmarks, grid_steps)


# ---------------------------------------------------------------------------
# Head parameter construction (deterministic, in-script)
# ---------------------------------------------------------------------------
def init_head_params(key, in_channels, n_landmarks, *, std, zero_bias):
    """Returns per-head (hm, x, y) conv1x1 weights (L, C) and biases (L,)."""
    keys = jax.random.split(key, 6)
    params = {}
    for name, kw, kb in (("hm", keys[0], keys[1]),
                         ("x", keys[2], keys[3]),
                         ("y", keys[4], keys[5])):
        w = std * jax.random.normal(kw, (n_landmarks, in_channels), jnp.float32)
        if zero_bias:
            b = jnp.zeros((n_landmarks,), jnp.float32)
        else:
            b = 0.01 * jax.random.normal(kb, (n_landmarks,), jnp.float32)
        params[name + "_w"] = w
        params[name + "_b"] = b
    return params


# ---------------------------------------------------------------------------
# Pure-JAX reference for correctness (mimics bf16 MXU inputs, f32 accumulate)
# ---------------------------------------------------------------------------
def _ref_head(x_nchw, w, b):
    xq = x_nchw.astype(jnp.bfloat16).astype(jnp.float32)
    wq = w.astype(jnp.bfloat16).astype(jnp.float32)
    return jnp.einsum("nchw,oc->nohw", xq, wq) + b[None, :, None, None]


def ref_forward(x1, x2, p1, p2):
    out = []
    for x, p in ((x1, p1), (x2, p2)):
        out.append((_ref_head(x, p["hm_w"], p["hm_b"]),
                    _ref_head(x, p["x_w"], p["x_b"]),
                    _ref_head(x, p["y_w"], p["y_b"])))
    return out


# ---------------------------------------------------------------------------
if __name__ == "__main__":
    key = jax.random.PRNGKey(0)
    k_x1, k_x2, k_p1, k_p2 = jax.random.split(key, 4)

    # Small shapes consistent with PIPNet at width_mult=0.125:
    #   in_channels_1 = int(256 * 0.125) = 32   (stride-16 features)
    #   in_channels_2 = int(512 * 0.125) = 64   (stride-32 features)
    N = 2
    n_landmarks = 16
    C1, H1, W1 = 32, 16, 16
    C2, H2, W2 = 64, 8, 8

    # TODO(synk): backbone (resnet18) not provided; synthetic feature maps instead.
    x1 = jax.random.normal(k_x1, (N, C1, H1, W1), jnp.float32)
    x2 = jax.random.normal(k_x2, (N, C2, H2, W2), jnp.float32)

    # head_1: default conv init (small random); head_2: normal(std=0.001), bias=0
    # (as in the PyTorch module's nn.init calls).
    params1 = init_head_params(k_p1, C1, n_landmarks, std=0.05, zero_bias=False)
    params2 = init_head_params(k_p2, C2, n_landmarks, std=0.001, zero_bias=True)

    # Fused head params prepared ONCE, outside the jitted forward.
    w1, b1 = fuse_level_params(params1)
    w2, b2 = fuse_level_params(params2)

    # 2 grid steps when the batch allows it (keeps both v7x TensorCores busy);
    # the extra step costs ~0.35 us on single-TC chips -- negligible.
    grid_steps = 2 if (N >= 2 and N % 2 == 0) else 1

    out = pipnet_forward(x1, x2, w1, b1, w2, b2,
                         n_landmarks=n_landmarks, grid_steps=grid_steps)
    out = jax.block_until_ready(out)

    ref = ref_forward(x1, x2, params1, params2)

    ok = True
    for a_tuple, r_tuple in zip(out, ref):
        for a, r in zip(a_tuple, r_tuple):
            assert a.shape == r.shape, (a.shape, r.shape)
            ok &= bool(jnp.allclose(a, r, atol=1e-3, rtol=1e-3))

    expected_shapes = [
        (N, n_landmarks, H1, W1),
        (N, n_landmarks, H2, W2),
    ]
    for lvl, exp in zip(out, expected_shapes):
        for t in lvl:
            assert t.shape == exp, (t.shape, exp)

    if ok:
        print("KERNEL_OK")
    else:
        raise SystemExit("mismatch vs reference")
</pallas_src>

<mosaic_0001>
module attributes {stable_mosaic.version = 11 : i64} {
  func.func @kernel(%arg0: i32, %arg1: memref<1x32x256xf32, #tpu.memory_space<vmem>>, %arg2: memref<1x64x64xf32, #tpu.memory_space<vmem>>, %arg3: memref<48x32xbf16, #tpu.memory_space<vmem>>, %arg4: memref<48x1xf32, #tpu.memory_space<vmem>>, %arg5: memref<48x64xbf16, #tpu.memory_space<vmem>>, %arg6: memref<48x1xf32, #tpu.memory_space<vmem>>, %arg7: memref<1x48x256xf32, #tpu.memory_space<vmem>>, %arg8: memref<1x48x64xf32, #tpu.memory_space<vmem>>) attributes {dimension_semantics = [#tpu.dimension_semantics<parallel>], iteration_bounds = array<i64: 2>, scalar_prefetch = 0 : i64, scratch_operands = 0 : i64, tpu.core_type = #tpu.core_type<tc>, window_params = [{transform_indices = @transform_0, window_bounds = array<i64: 1, 32, 256>}, {transform_indices = @transform_1, window_bounds = array<i64: 1, 64, 64>}, {pipeline_mode = #tpu.pipeline_mode<synchronous>, transform_indices = @transform_2, window_bounds = array<i64: 48, 32>}, {pipeline_mode = #tpu.pipeline_mode<synchronous>, transform_indices = @transform_3, window_bounds = array<i64: 48, 1>}, {pipeline_mode = #tpu.pipeline_mode<synchronous>, transform_indices = @transform_4, window_bounds = array<i64: 48, 64>}, {pipeline_mode = #tpu.pipeline_mode<synchronous>, transform_indices = @transform_5, window_bounds = array<i64: 48, 1>}, {transform_indices = @transform_6, window_bounds = array<i64: 1, 48, 256>}, {transform_indices = @transform_7, window_bounds = array<i64: 1, 48, 64>}]} {
    %c0 = arith.constant 0 : index
    %c0_0 = arith.constant 0 : index
    %0 = vector.load %arg3[%c0, %c0_0] : memref<48x32xbf16, #tpu.memory_space<vmem>>, vector<48x32xbf16>
    %c0_1 = arith.constant 0 : index
    %c0_2 = arith.constant 0 : index
    %1 = vector.load %arg5[%c0_1, %c0_2] : memref<48x64xbf16, #tpu.memory_space<vmem>>, vector<48x64xbf16>
    %c0_3 = arith.constant 0 : index
    %c0_4 = arith.constant 0 : index
    %2 = vector.load %arg4[%c0_3, %c0_4] : memref<48x1xf32, #tpu.memory_space<vmem>>, vector<48x1xf32>
    %c0_5 = arith.constant 0 : index
    %c0_6 = arith.constant 0 : index
    %3 = vector.load %arg6[%c0_5, %c0_6] : memref<48x1xf32, #tpu.memory_space<vmem>>, vector<48x1xf32>
    %c0_7 = arith.constant 0 : index
    %c0_8 = arith.constant 0 : index
    %c0_9 = arith.constant 0 : index
    %4 = vector.load %arg1[%c0_7, %c0_8, %c0_9] : memref<1x32x256xf32, #tpu.memory_space<vmem>>, vector<1x32x256xf32>
    %5 = vector.shape_cast %4 : vector<1x32x256xf32> to vector<32x256xf32>
    %6 = arith.truncf %5 : vector<32x256xf32> to vector<32x256xbf16>
    %c0_10 = arith.constant 0 : index
    %c0_11 = arith.constant 0 : index
    %c0_12 = arith.constant 0 : index
    %7 = vector.load %arg2[%c0_10, %c0_11, %c0_12] : memref<1x64x64xf32, #tpu.memory_space<vmem>>, vector<1x64x64xf32>
    %8 = vector.shape_cast %7 : vector<1x64x64xf32> to vector<64x64xf32>
    %9 = arith.truncf %8 : vector<64x64xf32> to vector<64x64xbf16>
    %cst = arith.constant dense<0.000000e+00> : vector<48x256xf32>
    %10 = tpu.matmul %0, %6, %cst {dimension_numbers = #tpu.dot_dimension_numbers<[1], [0], [0], [1], [0, 0, 1, 1], [], []>} : vector<48x32xbf16>, vector<32x256xbf16>, vector<48x256xf32> -> vector<48x256xf32>
    %11 = vector.broadcast %2 : vector<48x1xf32> to vector<48x256xf32>
    %12 = arith.addf %10, %11 : vector<48x256xf32>
    %c0_13 = arith.constant 0 : index
    %c0_14 = arith.constant 0 : index
    %c0_15 = arith.constant 0 : index
    %13 = vector.load %arg7[%c0_13, %c0_14, %c0_15] : memref<1x48x256xf32, #tpu.memory_space<vmem>>, vector<1x48x256xf32>
    %14 = vector.shape_cast %13 : vector<1x48x256xf32> to vector<48x256xf32>
    %15 = vector.shape_cast %12 : vector<48x256xf32> to vector<1x48x256xf32>
    tpu.vector_store %arg7[%c0_13, %c0_14, %c0_15], %15 {strides = array<i32>} : memref<1x48x256xf32, #tpu.memory_space<vmem>>, vector<1x48x256xf32>,
    %cst_16 = arith.constant dense<0.000000e+00> : vector<48x64xf32>
    %16 = tpu.matmul %1, %9, %cst_16 {dimension_numbers = #tpu.dot_dimension_numbers<[1], [0], [0], [1], [0, 0, 1, 1], [], []>} : vector<48x64xbf16>, vector<64x64xbf16>, vector<48x64xf32> -> vector<48x64xf32>
    %17 = vector.broadcast %3 : vector<48x1xf32> to vector<48x64xf32>
    %18 = arith.addf %16, %17 : vector<48x64xf32>
    %c0_17 = arith.constant 0 : index
    %c0_18 = arith.constant 0 : index
    %c0_19 = arith.constant 0 : index
    %19 = vector.load %arg8[%c0_17, %c0_18, %c0_19] : memref<1x48x64xf32, #tpu.memory_space<vmem>>, vector<1x48x64xf32>
    %20 = vector.shape_cast %19 : vector<1x48x64xf32> to vector<48x64xf32>
    %21 = vector.shape_cast %18 : vector<48x64xf32> to vector<1x48x64xf32>
    tpu.vector_store %arg8[%c0_17, %c0_18, %c0_19], %21 {strides = array<i32>} : memref<1x48x64xf32, #tpu.memory_space<vmem>>, vector<1x48x64xf32>,
    return
  }
  func.func @transform_0(%arg0: i32) -> (i32, i32, i32) {
    %c0_i32 = arith.constant 0 : i32
    %c0_i32_0 = arith.constant 0 : i32
    %c0_i32_1 = arith.constant 0 : i32
    return %arg0, %c0_i32, %c0_i32_0 : i32, i32, i32
  }
  func.func @transform_1(%arg0: i32) -> (i32, i32, i32) {
    %c0_i32 = arith.constant 0 : i32
    %c0_i32_0 = arith.constant 0 : i32
    %c0_i32_1 = arith.constant 0 : i32
    return %arg0, %c0_i32, %c0_i32_0 : i32, i32, i32
  }
  func.func @transform_2(%arg0: i32) -> (i32, i32) {
    %c0_i32 = arith.constant 0 : i32
    %c0_i32_0 = arith.constant 0 : i32
    %c0_i32_1 = arith.constant 0 : i32
    return %c0_i32, %c0_i32_0 : i32, i32
  }
  func.func @transform_3(%arg0: i32) -> (i32, i32) {
    %c0_i32 = arith.constant 0 : i32
    %c0_i32_0 = arith.constant 0 : i32
    %c0_i32_1 = arith.constant 0 : i32
    return %c0_i32, %c0_i32_0 : i32, i32
  }
  func.func @transform_4(%arg0: i32) -> (i32, i32) {
    %c0_i32 = arith.constant 0 : i32
    %c0_i32_0 = arith.constant 0 : i32
    %c0_i32_1 = arith.constant 0 : i32
    return %c0_i32, %c0_i32_0 : i32, i32
  }
  func.func @transform_5(%arg0: i32) -> (i32, i32) {
    %c0_i32 = arith.constant 0 : i32
    %c0_i32_0 = arith.constant 0 : i32
    %c0_i32_1 = arith.constant 0 : i32
    return %c0_i32, %c0_i32_0 : i32, i32
  }
  func.func @transform_6(%arg0: i32) -> (i32, i32, i32) {
    %c0_i32 = arith.constant 0 : i32
    %c0_i32_0 = arith.constant 0 : i32
    %c0_i32_1 = arith.constant 0 : i32
    return %arg0, %c0_i32, %c0_i32_0 : i32, i32, i32
  }
  func.func @transform_7(%arg0: i32) -> (i32, i32, i32) {
    %c0_i32 = arith.constant 0 : i32
    %c0_i32_0 = arith.constant 0 : i32
    %c0_i32_1 = arith.constant 0 : i32
    return %arg0, %c0_i32, %c0_i32_0 : i32, i32, i32
  }
}

</mosaic_0001>

<bundles_post_ra>
// kernel: pipnet_forward.1
= control target key start
LH: loop header
LB: loop body
LE: loop exit
PB: predicated region body
PF: predicated region fallthrough
CT: control target
= control target key end

     0   :  { %s835_s24 = smov 0   ;;  %s976_s0 = inlined_call_operand.vmem [shape: f32[2,32,256], index: 0, kind: input, shape index: {}]   ;;  %s977_s1 = inlined_call_operand.vmem [shape: f32[2,64,64], index: 1, kind: input, shape index: {}]   ;;  %s978_s2 = inlined_call_operand.vmem [shape: bf16[48,32], index: 2, kind: input, shape index: {}]   ;;  %s979_s3 = inlined_call_operand.vmem [shape: f32[48,1], index: 3, kind: input, shape index: {}]   ;;  %s980_s4 = inlined_call_operand.vmem [shape: bf16[48,64], index: 4, kind: input, shape index: {}]   ;;  %s981_s5 = inlined_call_operand.vmem [shape: f32[48,1], index: 5, kind: input, shape index: {}]   ;;  %s982_s6 = inlined_call_operand.vmem [shape: f32[2,48,256], index: 6, kind: output, shape index: {0}]   ;;  %s983_s7 = inlined_call_operand.vmem [shape: f32[2,48,64], index: 7, kind: output, shape index: {1}]  }
   0x1 LB: > { %s709_s25 = sadd.s32 4294967295, %s790_s24   ;;  %p713_p0 = scmp.ge.s32.totalorder %s790_s24, 1  ;;  %s790_s24 = sphi %s835_s24, %s18_s24  }
   0x2   : > { %p250_p1 = scmp.lt.s32.totalorder %s790_s24, 3 }
   0x4   : > { %p251_p2 = pnand %p713_p0, %p250_p1 }
   0x5   : > { %p292_p3 = scmp.lt.s32.totalorder (!%p251_p2), %s709_s25, 1  ;;  %v792_v0 = vmov (!%p251_p2), 0.0   ;;  %v793_v1 = vmov (!%p251_p2), 0   ;;  %vm794_vm0 = vmmov (!%p251_p2), 0   ;;  %v327_v22 = vld [vmem:[%s979_s3 + $0x10] sm:$0xff] (!%p251_p2)  ;;  %v325_v23 = vld [vmem:[%s979_s3] sm:$0xff] (!%p251_p2) }
   0x6   : > { %254 = sbr.rel (%p251_p2) target bundleno = 268 (0x10c), region = 44  ;;  %743 = vmatprep.subr.bf16.mxu1 (!%p251_p2), %v792_v0  ;;  %448 = vmatprep.mubr.bf16.mxu0 (!%p251_p2), %v793_v1  ;;  %v778_v24 = vld [vmem:[%s978_s2] sm:$0xff] (!%p251_p2)   ;;  %vm406_vm1 = vcmask (!%p251_p2), 261120   ;;  %v328_v26 = vld [vmem:[%s979_s3 + $0x18] sm:$0xff] (!%p251_p2)  ;;  %v326_v29 = vld [vmem:[%s979_s3 + $0x8] sm:$0xff] (!%p251_p2)  ;;  %vm536_vm2 = vcmask (!%p251_p2), 523264  }
   0x7   : > { %751 = vmatprep.mubr.msk.bf16.mxu1 (!%p251_p2), %vm794_vm0, %v792_v0  ;;  %777 = vset.pattern.permute.xlu1 (!%p251_p2), %v793_v1  ;;  %v330_v31 = vld [vmem:[%s979_s3 + $0x28] sm:$0xff] (!%p251_p2)  ;;  %v329_v32 = vld [vmem:[%s979_s3 + $0x20] sm:$0xff] (!%p251_p2)  ;;  %v334_v37 = vld [vmem:[%s981_s5 + $0x18] sm:$0xff] (!%p251_p2) }
   0x8   : > { %776 = vset.pattern.permute.xlu0 (!%p251_p2), %v793_v1  ;;  %373 = vperm.xlu1 (!%p251_p2), %777, %v327_v22   ;;  %v779_v33 = vld [vmem:[%s980_s4] sm:$0xff] (!%p251_p2)   ;;  %v780_v34 = vld [vmem:[%s978_s2 + $0x8] sm:$0xff] (!%p251_p2)   ;;  %v333_v38 = vld [vmem:[%s981_s5 + $0x10] sm:$0xff] (!%p251_p2) }
   0x9   : > { %363 = vperm.xlu0 (!%p251_p2), %776, %v325_v23   ;;  %v332_v35 = vld [vmem:[%s981_s5 + $0x8] sm:$0xff] (!%p251_p2)  ;;  %v331_v36 = vld [vmem:[%s981_s5] sm:$0xff] (!%p251_p2)  ;;  %v782_v40 = vld [vmem:[%s978_s2 + $0x10] sm:$0xff] (!%p251_p2)  }
   0xa   : > { %v781_v39 = vld [vmem:[%s980_s4 + $0x8] sm:$0xff] (!%p251_p2)   ;;  %v335_v42 = vld [vmem:[%s981_s5 + $0x20] sm:$0xff] (!%p251_p2)  ;;  %v783_v43 = vld [vmem:[%s980_s4 + $0x10] sm:$0xff] (!%p251_p2)  }
   0xb   : > { %v336_v41 = vld [vmem:[%s981_s5 + $0x28] sm:$0xff] (!%p251_p2) }
   0xc   : > { %378 = vperm.xlu1 (!%p251_p2), %777, %v328_v26  }
   0xd   : > { %s985_s25 = smov (!%p292_p3, %s709_s25), 1  ;;  %368 = vperm.xlu0 %776, %v326_v29  }
   0xe   : > { %s734_s26 = sshll.u32 %s985_s25, 6  ;;  %s763_s27 = smul.u32 96, %s985_s25 }
   0xf   : > { %s296_s29 = scalar_lea.vmem %s976_s0, %s734_s26  ;;  %s858_s9 = scalar_lea.vmem %s977_s1, %s734_s26 }
  0x10   : > { %v338_v2 = vld [vmem:[%s296_s29 + $0x8] sm:$0xff]  ;;  %v340_v3 = vld [vmem:[%s296_s29 + $0x18] sm:$0xff]  ;;  %v349_v4 = vld [vmem:[%s858_s9] sm:$0xff]  ;;  %388 = vperm.xlu1 %777, %v330_v31   ;;  %s941_s30 = scalar_lea.vmem %s982_s6, %s763_s27  ;;  %s764_s8 = smul.u32 48, %s985_s25 }
  0x11   : > { %v346_v5 = vpack.c.bf16 %v340_v3, %v338_v2  ;;  %v350_v6 = vld [vmem:[%s858_s9 + $0x8] sm:$0xff]  ;;  %v337_v7 = vld [vmem:[%s296_s29] sm:$0xff]  ;;  %v339_v8 = vld [vmem:[%s296_s29 + $0x10] sm:$0xff]  ;;  %383 = vperm.xlu0 %776, %v329_v32  }
  0x12   : > { %v357_v9 = vpack.c.bf16 %v350_v6, %v349_v4  ;;  %v345_v10 = vpack.c.bf16 %v339_v8, %v337_v7  ;;  %v342_v11 = vld [vmem:[%s296_s29 + $0x28] sm:$0xff]  ;;  %v344_v12 = vld [vmem:[%s296_s29 + $0x38] sm:$0xff]  ;;  %v351_v13 = vld [vmem:[%s858_s9 + $0x10] sm:$0xff]  ;;  %s951_s11 = scalar_lea.vmem %s983_s7, %s764_s8 }
  0x13   : > { %416 = vmatprep.subr.bf16.mxu0 %v346_v5  ;;  %v348_v14 = vpack.c.bf16 %v344_v12, %v342_v11  ;;  %v352_v15 = vld [vmem:[%s858_s9 + $0x18] sm:$0xff]  ;;  %v341_v16 = vld [vmem:[%s296_s29 + $0x20] sm:$0xff]  ;;  %v343_v17 = vld [vmem:[%s296_s29 + $0x30] sm:$0xff] }
  0x14   : > { %744 = vmatpush3.bf16.msra.mxu1 %v357_v9  ;;  %417 = vmatpush1.bf16.msra.mxu0 %v345_v10  ;;  %v358_v18 = vpack.c.bf16 %v352_v15, %v351_v13  ;;  %v347_v19 = vpack.c.bf16 %v343_v17, %v341_v16  ;;  %v353_v20 = vld [vmem:[%s858_s9 + $0x20] sm:$0xff]  ;;  %v354_v21 = vld [vmem:[%s858_s9 + $0x28] sm:$0xff]  ;;  %v355_v27 = vld [vmem:[%s858_s9 + $0x30] sm:$0xff] }
  0x15   : > { %745 = vmatprep.subr.bf16.mxu1 %v792_v0  ;;  %418 = vmatprep.subr.bf16.mxu0 %v348_v14  ;;  %v359_v25 = vpack.c.bf16 %v354_v21, %v353_v20  ;;  %v356_v28 = vld [vmem:[%s858_s9 + $0x38] sm:$0xff] }
  0x16   : > { %v360_v30 = vpack.c.bf16 %v356_v28, %v355_v27  ;;  %498 = vperm.xlu1 %777, %v332_v35   ;;  %493 = vperm.xlu0 %776, %v331_v36  }
  0x18   : > { %746 = vmatpush3.bf16.msra.mxu1 %v358_v18  ;;  %419 = vmatpush1.bf16.msra.mxu0 %v347_v19 }
  0x19   : > { %747 = vmatprep.subr.bf16.mxu1 %v792_v0 }
  0x1a   : > { %508 = vperm.xlu1 %777, %v334_v37   ;;  %503 = vperm.xlu0 %776, %v333_v38  }
  0x1b   : > { %723 = vmatmul.mubr.msk.bf16.vlgmr.msra.gmra.mrb[0].mxu0 %vm406_vm1, %v778_v24 }
  0x1c   : > { %748 = vmatpush3.bf16.msra.mxu1 %v359_v25  ;;  %458 = vmatprep.mubr.bf16.mxu0 %v793_v1 }
  0x1d   : > { %749 = vmatprep.subr.bf16.mxu1 %v792_v0 }
  0x1e   : > { %518 = vperm.xlu1 %777, %v336_v41   ;;  %513 = vperm.xlu0 %776, %v335_v42  }
  0x20   : > { %750 = vmatpush3.bf16.msra.mxu1 %v360_v30 }
  0x23   : > { %752 = vmatmul.mubr.msk.bf16.vlgmr.msra.gmra.mrb[0].mxu1 %vm536_vm2, %v779_v33  ;;  %724 = vmatmul.mubr.msk.bf16.gmra.mrb[4].mxu0 %vm406_vm1, %v780_v34 }
  0x24   : > { %755 = vmatprep.mubr.msk.bf16.mxu1 %vm794_vm0, %v792_v0  ;;  %468 = vmatprep.mubr.bf16.mxu0 %v793_v1 }
  0x2b   : > { %756 = vmatmul.mubr.msk.bf16.gmra.mrb[4].mxu1 %vm536_vm2, %v781_v39  ;;  %725 = vmatmul.mubr.msk.bf16.gmra.mrb[8].mxu0 %vm406_vm1, %v782_v40 }
  0x2c   : > { %759 = vmatprep.mubr.msk.bf16.mxu1 %vm794_vm0, %v792_v0 }
  0x33   : > { %760 = vmatmul.mubr.msk.bf16.gmra.mrb[8].mxu1 %vm536_vm2, %v783_v43 }
  0x87   : > { %v374_v44 = vpop.permute.xlu1 %373 }
  0x88   : > { %v364_v45 = vpop.permute.xlu0 %363 }
  0x8b   : > { %v379_v46 = vpop.permute.xlu1 %378 }
  0x8c   : > { %v369_v47 = vpop.permute.xlu0 %368 }
  0x8f   : > { %v389_v48 = vpop.permute.xlu1 %388 }
  0x90   : > { %v384_v50 = vpop.permute.xlu0 %383 }
  0x95   : > { %v499_v58 = vpop.permute.xlu1 %498  ;;  %v494_v59 = vpop.permute.xlu0 %493 }
  0x99   : > { %v509_v10 = vpop.permute.xlu1 %508  ;;  %v504_v11 = vpop.permute.xlu0 %503 }
  0x9d   : > { %v514_v26 = vpop.permute.xlu0 %513  ;;  %v519_v30 = vpop.permute.xlu1 %518 }
  0xee   : > { %v450_v49 = vpop.f32.mrb[0].mxu0 }
  0xef   : > { %v451_v51 = vadd.f32 %v450_v49, %v364_v45  ;;  %v452_v52 = vpop.f32.mrb[1].mxu0 }
  0xf0   : > { %v453_v53 = vadd.f32 %v452_v52, %v364_v45  ;;  %v454_v54 = vpop.f32.mrb[2].mxu0 }
  0xf1   : > { %479 = vst [vmem:[%s941_s30] sm:$0xff] %v451_v51  ;;  %v455_v55 = vadd.f32 %v454_v54, %v369_v47  ;;  %v456_v56 = vpop.f32.mrb[3].mxu0 }
  0xf2   : > { %480 = vst [vmem:[%s941_s30 + $0x8] sm:$0xff] %v453_v53  ;;  %v457_v57 = vadd.f32 %v456_v56, %v369_v47 }
  0xf3   : > { %481 = vst [vmem:[%s941_s30 + $0x10] sm:$0xff] %v455_v55 }
  0xf4   : > { %482 = vst [vmem:[%s941_s30 + $0x18] sm:$0xff] %v457_v57 }
  0xf6   : > { %v580_v60 = vpop.f32.mrb[0].mxu1  ;;  %v460_v61 = vpop.f32.mrb[4].mxu0 }
  0xf7   : > { %v581_v62 = vadd.f32 %v580_v60, %v494_v59  ;;  %v461_v63 = vadd.f32 %v460_v61, %v374_v44  ;;  %v753_v0 = vpop.f32.mrb[1].mxu1  ;;  %v462_v1 = vpop.f32.mrb[5].mxu0 }
  0xf8   : > { %v463_v2 = vadd.f32 %v462_v1, %v374_v44  ;;  %v583_v3 = vpop.f32.mrb[2].mxu1  ;;  %v464_v4 = vpop.f32.mrb[6].mxu0 }
  0xf9   : > { %603 = vst.msk [vmem:[%s951_s11] sm:$0xff] %vm536_vm2, %v581_v62  ;;  %483 = vst [vmem:[%s941_s30 + $0x20] sm:$0xff] %v461_v63  ;;  %v584_v5 = vadd.f32 %v583_v3, %v499_v58  ;;  %v465_v6 = vadd.f32 %v464_v4, %v379_v46  ;;  %v754_v7 = vpop.f32.mrb[3].mxu1  ;;  %v466_v8 = vpop.f32.mrb[7].mxu0 }
  0xfa   : > { %484 = vst [vmem:[%s941_s30 + $0x28] sm:$0xff] %v463_v2  ;;  %v467_v9 = vadd.f32 %v466_v8, %v379_v46 }
  0xfb   : > { %604 = vst.msk [vmem:[%s951_s11 + $0x8] sm:$0xff] %vm536_vm2, %v584_v5  ;;  %485 = vst [vmem:[%s941_s30 + $0x30] sm:$0xff] %v465_v6 }
  0xfc   : > { %486 = vst [vmem:[%s941_s30 + $0x38] sm:$0xff] %v467_v9 }
  0xfe   : > { %v588_v12 = vpop.f32.mrb[4].mxu1  ;;  %v470_v13 = vpop.f32.mrb[8].mxu0 }
  0xff   : > { %v589_v14 = vadd.f32 %v588_v12, %v504_v11  ;;  %v471_v15 = vadd.f32 %v470_v13, %v384_v50  ;;  %v757_v16 = vpop.f32.mrb[5].mxu1  ;;  %v472_v17 = vpop.f32.mrb[9].mxu0 }
 0x100   : > { %v473_v18 = vadd.f32 %v472_v17, %v384_v50  ;;  %v591_v19 = vpop.f32.mrb[6].mxu1  ;;  %v474_v20 = vpop.f32.mrb[10].mxu0 }
 0x101   : > { %605 = vst.msk [vmem:[%s951_s11 + $0x10] sm:$0xff] %vm536_vm2, %v589_v14  ;;  %487 = vst [vmem:[%s941_s30 + $0x40] sm:$0xff] %v471_v15  ;;  %v592_v21 = vadd.f32 %v591_v19, %v509_v10  ;;  %v475_v22 = vadd.f32 %v474_v20, %v389_v48  ;;  %v758_v23 = vpop.f32.mrb[7].mxu1  ;;  %v476_v24 = vpop.f32.mrb[11].mxu0 }
 0x102   : > { %488 = vst [vmem:[%s941_s30 + $0x48] sm:$0xff] %v473_v18  ;;  %v477_v25 = vadd.f32 %v476_v24, %v389_v48 }
 0x103   : > { %606 = vst.msk [vmem:[%s951_s11 + $0x18] sm:$0xff] %vm536_vm2, %v592_v21  ;;  %489 = vst [vmem:[%s941_s30 + $0x50] sm:$0xff] %v475_v22 }
 0x104   : > { %490 = vst [vmem:[%s941_s30 + $0x58] sm:$0xff] %v477_v25 }
 0x106   : > { %v596_v27 = vpop.f32.mrb[8].mxu1 }
 0x107   : > { %v597_v28 = vadd.f32 %v596_v27, %v514_v26  ;;  %v761_v29 = vpop.f32.mrb[9].mxu1 }
 0x108   : > { %v599_v31 = vpop.f32.mrb[10].mxu1 }
 0x109   : > { %607 = vst.msk [vmem:[%s951_s11 + $0x20] sm:$0xff] %vm536_vm2, %v597_v28  ;;  %v600_v32 = vadd.f32 %v599_v31, %v519_v30  ;;  %v762_v33 = vpop.f32.mrb[11].mxu1 }
 0x10b   : > { %608 = vst.msk [vmem:[%s951_s11 + $0x28] sm:$0xff] %vm536_vm2, %v600_v32 }
 0x10c PF: > { %s18_s24 = sadd.s32 1, %s790_s24  }
 0x10d   : > { %p15_p4 = scmp.ge.s32.totalorder %s18_s24, 4  }
 0x10f   :  { %17 = sbr.rel (!%p15_p4) target bundleno = 1 (0x1), region = 89 }

</bundles_post_ra>
